<compile_context>
chip_gen: v5e
topology: v5e:2x2
jax: 0.10.0
libtpu: 0.0.40
codegen_flags: <defaults>
</compile_context>

<pallas_src>
import math

import jax
import jax.numpy as jnp
from jax import lax
from jax.experimental import pallas as pl
from jax.experimental.pallas import tpu as pltpu

EPS = 1e-5
NEG_SLOPE = 0.01
LANE = 128


def _round_up(x, m):
    return (x + m - 1) // m * m


def _vmem_limit_bytes():
    """Generation-aware scoped-VMEM limit (v7x: 64 MiB/TC, v5e/v6e: 128 MiB)."""
    try:
        cap = pltpu.get_tpu_info().vmem_capacity_bytes
    except Exception:
        cap = 64 * 1024 * 1024  # conservative (v7x per-TensorCore) fallback
    return min(int(cap * 3 // 4), 100 * 1024 * 1024)


def _pick_row_tile(Ho, Wo, C, Cp, budget_bytes):
    """Largest output-row tile th (th*Wo % 8 == 0) whose working set fits VMEM."""
    tf = 8 // math.gcd(Wo, 8)
    th = _round_up(max(1, min(Ho, max(1, 4096 // max(Wo, 1)))), tf)

    def need(t):
        slab = 6 * (t + 1) * Wo * C      # (3, 2*(t+1)*Wo, C) input slab
        wmat = 9 * C * Cp                # per-tap weight matrices
        ytile = t * Wo * Cp              # f32 conv tile / accumulator
        lhs = t * Wo * C                 # live tap operand
        return 4 * (2 * slab + 2 * wmat + 3 * ytile + 2 * lhs) + (2 << 20)

    while th > tf and need(th) > budget_bytes:
        th -= tf
    return max(th, tf)


def downsample_pallas(x, w, gamma, beta, *, compute_dtype=jnp.float32):
    """Forward pass of DownSample.

    x: (N, C, H, W) f32 NCHW.  w: (C, C, 3, 3) OIHW (no bias).
    gamma, beta: (C,) BatchNorm2d affine parameters.
    Returns (N, C, ceil(H/2), ceil(W/2)) f32 NCHW.
    """
    N, C, H, W = x.shape
    Ho = (H - 1) // 2 + 1
    Wo = (W - 1) // 2 + 1
    Cp = _round_up(C, LANE)
    M = N * Ho * Wo                       # true element count for batch stats
    inv_m = 1.0 / float(M)

    vmem_limit = _vmem_limit_bytes()
    th = _pick_row_tile(Ho, Wo, C, Cp, int(vmem_limit * 0.8))
    R = -(-Ho // th)                      # row tiles per image
    Ho_pad = R * th
    Sj = th + 1                           # rows per parity inside a slab
    TM = th * Wo                          # output pixels per grid step
    NT = N * R                            # total grid steps

    # Recompute the conv in pass 2 (instead of storing the lane-padded (M, Cp)
    # intermediate) whenever re-reading the slab moves fewer bytes.
    store_y = 9 * C >= 2 * Cp

    # ------------------- wrapper-side layout (no im2col) --------------------
    # NHWC first (nothing 9x-expanded is ever transposed), then reflect pad.
    x_nhwc = jnp.transpose(x, (0, 2, 3, 1))
    xp = jnp.pad(x_nhwc, ((0, 0), (1, 1), (1, 1), (0, 0)), mode="reflect")

    # Column phases kw=0,1,2: xcol[n, kw, h, wo, c] = xp[n, h, 2*wo + kw, c].
    xcol = jnp.stack(
        [lax.slice_in_dim(xp, kw, kw + 2 * Wo - 1, stride=2, axis=2)
         for kw in range(3)], axis=1)                     # (N, 3, H+2, Wo, C)

    # Zero-pad rows so every row-tile slab is in range (zero rows give zero
    # conv rows; those rows are masked out of the stats and cropped at the end).
    rows_needed = 2 * th * R + 2
    if rows_needed > H + 2:
        xcol = jnp.pad(
            xcol, ((0, 0), (0, 0), (0, rows_needed - (H + 2)), (0, 0), (0, 0)))

    # Per-tile slabs, split by row parity and flattened so every conv tap is a
    # contiguous (TM, C) slice in the kernel:
    #   slab[t, kw, (p*Sj + j)*Wo + wo, c] = xp[n, 2*th*r + 2*j + p, 2*wo + kw, c]
    slab_list = []
    for r in range(R):
        base = 2 * th * r
        xe = lax.slice_in_dim(xcol, base, base + 2 * th + 1, stride=2, axis=2)
        xo = lax.slice_in_dim(xcol, base + 1, base + 2 * th + 2, stride=2, axis=2)
        slab_list.append(jnp.concatenate([xe, xo], axis=2))   # (N, 3, 2*Sj, Wo, C)
    slabs = jnp.stack(slab_list, axis=1)                       # (N, R, 3, 2*Sj, Wo, C)
    slabs = slabs.reshape(NT, 3, 2 * Sj * Wo, C).astype(compute_dtype)

    # Per-tap weight matrices w_taps[3*kh+kw, ci, co], co lane-padded to Cp.
    w_taps = jnp.transpose(w, (2, 3, 1, 0)).reshape(9, C, C)
    w_taps = jnp.pad(w_taps, ((0, 0), (0, 0), (0, Cp - C))).astype(compute_dtype)

    gamma_p = jnp.pad(gamma.astype(jnp.float32), (0, Cp - C)).reshape(1, Cp)
    beta_p = jnp.pad(beta.astype(jnp.float32), (0, Cp - C)).reshape(1, Cp)

    # ------------------ in-kernel helpers (close over static sizes) ---------
    def conv_tile(slab_ref, w_ref):
        """9 accumulated per-tap MXU matmuls -> (TM, Cp) f32 conv tile."""
        acc = jnp.zeros((TM, Cp), jnp.float32)
        for kh in range(3):
            start = ((kh % 2) * Sj + kh // 2) * Wo
            for kw in range(3):
                lhs = slab_ref[kw, pl.ds(start, TM), :]          # (TM, C)
                acc = acc + jnp.dot(lhs, w_ref[3 * kh + kw],
                                    preferred_element_type=jnp.float32)
        return acc

    def tile_stats(acc, r):
        """Per-tile channel sum / sum-of-squares; mask padded output rows."""
        row = lax.broadcasted_iota(jnp.int32, (TM, 1), 0)
        valid = (Ho - r * th) * Wo
        masked = jnp.where(row < valid, acc, 0.0)
        s = jnp.sum(masked, axis=0, keepdims=True)
        q = jnp.sum(masked * masked, axis=0, keepdims=True)
        return jnp.concatenate([s, q, jnp.zeros((6, Cp), jnp.float32)], axis=0)

    def bn_fold(s_ref, q_ref, g_ref, b_ref):
        """Training-mode BN folded to per-channel scale/shift (rsqrt -> EUP)."""
        mean = s_ref[...] * inv_m
        var = jnp.maximum(q_ref[...] * inv_m - mean * mean, 0.0)
        scale = g_ref[...] * lax.rsqrt(var + EPS)
        shift = b_ref[...] - mean * scale
        return scale, shift

    def bn_lrelu(z):
        return jnp.where(z >= 0.0, z, NEG_SLOPE * z)

    # ----------------------------- pass-1 kernels ---------------------------
    def conv_stats_kernel(slab_ref, w_ref, y_ref, stat_ref):
        acc = conv_tile(slab_ref, w_ref)
        y_ref[...] = acc
        stat_ref[...] = tile_stats(acc, pl.program_id(1))

    def stats_only_kernel(slab_ref, w_ref, stat_ref):
        acc = conv_tile(slab_ref, w_ref)
        stat_ref[...] = tile_stats(acc, pl.program_id(1))

    # ----------------------------- pass-2 kernels ---------------------------
    def bn_lrelu_kernel(y_ref, s_ref, q_ref, g_ref, b_ref, o_ref):
        scale, shift = bn_fold(s_ref, q_ref, g_ref, b_ref)
        z = bn_lrelu(y_ref[...] * scale + shift)
        o_ref[...] = z[:, :C].astype(o_ref.dtype)

    def conv_bn_lrelu_kernel(slab_ref, w_ref, s_ref, q_ref, g_ref, b_ref, o_ref):
        acc = conv_tile(slab_ref, w_ref)
        scale, shift = bn_fold(s_ref, q_ref, g_ref, b_ref)
        z = bn_lrelu(acc * scale + shift)
        o_ref[...] = z[:, :C].astype(o_ref.dtype)

    # -------------------------------- specs ---------------------------------
    slab_spec = pl.BlockSpec((None, 3, 2 * Sj * Wo, C),
                             lambda n, r: (n * R + r, 0, 0, 0))
    w_spec = pl.BlockSpec((9, C, Cp), lambda n, r: (0, 0, 0))
    stat_spec = pl.BlockSpec((None, 8, Cp), lambda n, r: (n * R + r, 0, 0))
    vec_spec2 = pl.BlockSpec((1, Cp), lambda n, r: (0, 0))
    cparams2 = pltpu.CompilerParams(
        dimension_semantics=("parallel", "parallel"),
        vmem_limit_bytes=vmem_limit)

    # ------------- pass 1: conv (+ y) + per-tile partial stats --------------
    stat_shape = jax.ShapeDtypeStruct((NT, 8, Cp), jnp.float32)
    if store_y:
        y, stats = pl.pallas_call(
            conv_stats_kernel,
            out_shape=(jax.ShapeDtypeStruct((NT * TM, Cp), jnp.float32), stat_shape),
            grid_spec=pltpu.PrefetchScalarGridSpec(
                num_scalar_prefetch=0, grid=(N, R),
                in_specs=[slab_spec, w_spec],
                out_specs=[pl.BlockSpec((TM, Cp), lambda n, r: (n * R + r, 0)),
                           stat_spec]),
            compiler_params=cparams2,
        )(slabs, w_taps)
    else:
        y = None
        stats = pl.pallas_call(
            stats_only_kernel,
            out_shape=stat_shape,
            grid_spec=pltpu.PrefetchScalarGridSpec(
                num_scalar_prefetch=0, grid=(N, R),
                in_specs=[slab_spec, w_spec],
                out_specs=stat_spec),
            compiler_params=cparams2,
        )(slabs, w_taps)

    # ------------ tiny glue: reduce per-tile partials to batch sums ---------
    s_sum = jnp.sum(stats[:, 0, :], axis=0, keepdims=True)   # (1, Cp)
    q_sum = jnp.sum(stats[:, 1, :], axis=0, keepdims=True)   # (1, Cp)

    # --------------- pass 2: (conv +) BN fold + LeakyReLU -------------------
    out_shape = jax.ShapeDtypeStruct((NT * TM, C), jnp.float32)
    if store_y:
        out = pl.pallas_call(
            bn_lrelu_kernel,
            out_shape=out_shape,
            grid_spec=pltpu.PrefetchScalarGridSpec(
                num_scalar_prefetch=0, grid=(NT,),
                in_specs=[pl.BlockSpec((TM, Cp), lambda i: (i, 0)),
                          pl.BlockSpec((1, Cp), lambda i: (0, 0)),
                          pl.BlockSpec((1, Cp), lambda i: (0, 0)),
                          pl.BlockSpec((1, Cp), lambda i: (0, 0)),
                          pl.BlockSpec((1, Cp), lambda i: (0, 0))],
                out_specs=pl.BlockSpec((TM, C), lambda i: (i, 0))),
            compiler_params=pltpu.CompilerParams(
                dimension_semantics=("parallel",),
                vmem_limit_bytes=vmem_limit),
        )(y, s_sum, q_sum, gamma_p, beta_p)
    else:
        out = pl.pallas_call(
            conv_bn_lrelu_kernel,
            out_shape=out_shape,
            grid_spec=pltpu.PrefetchScalarGridSpec(
                num_scalar_prefetch=0, grid=(N, R),
                in_specs=[slab_spec, w_spec,
                          vec_spec2, vec_spec2, vec_spec2, vec_spec2],
                out_specs=pl.BlockSpec((TM, C), lambda n, r: (n * R + r, 0))),
            compiler_params=cparams2,
        )(slabs, w_taps, s_sum, q_sum, gamma_p, beta_p)

    # (NT*TM, C) -> (N, Ho_pad, Wo, C) -> crop -> NCHW.
    # TODO(synk): drop the trailing NHWC->NCHW transpose if the consumer
    # accepts NHWC (it costs one extra XLA pass over the output).
    out = out.reshape(N, Ho_pad, Wo, C)[:, :Ho]
    return jnp.transpose(out, (0, 3, 1, 2))


def downsample_ref(x, w, gamma, beta):
    """Pure-JAX reference matching PyTorch semantics (training-mode BN)."""
    xp = jnp.pad(x, ((0, 0), (0, 0), (1, 1), (1, 1)), mode="reflect")
    y = lax.conv_general_dilated(
        xp, w, window_strides=(2, 2), padding="VALID",
        dimension_numbers=("NCHW", "OIHW", "NCHW"),
        precision=lax.Precision.HIGHEST)
    mean = jnp.mean(y, axis=(0, 2, 3), keepdims=True)
    var = jnp.mean((y - mean) ** 2, axis=(0, 2, 3), keepdims=True)
    y_hat = (y - mean) * lax.rsqrt(var + EPS)
    y_hat = y_hat * gamma.reshape(1, -1, 1, 1) + beta.reshape(1, -1, 1, 1)
    return jnp.where(y_hat >= 0, y_hat, NEG_SLOPE * y_hat)


if __name__ == "__main__":
    key = jax.random.PRNGKey(0)
    k1, k2, k3, k4, k5 = jax.random.split(key, 5)

    # Primary shape from the module spec: batch=2, channels=4, spatial=16
    # (takes the small-C "recompute conv in pass 2" path).
    N, C, H, W = 2, 4, 16, 16
    x = jax.random.normal(k1, (N, C, H, W), dtype=jnp.float32)
    bound = 1.0 / (C * 9) ** 0.5
    w = jax.random.uniform(k2, (C, C, 3, 3), jnp.float32, -bound, bound)
    gamma = jnp.ones((C,), jnp.float32)
    beta = jnp.zeros((C,), jnp.float32)

    out = downsample_pallas(x, w, gamma, beta)
    jax.block_until_ready(out)
    ref = downsample_ref(x, w, gamma, beta)
    assert out.shape == (N, C, H // 2, W // 2)
    assert jnp.allclose(out, ref, atol=1e-4, rtol=1e-4)

    # Secondary shape exercising the large-C "store y" path (C == Cp == 128).
    N2, C2, H2, W2 = 1, 128, 8, 8
    x2 = jax.random.normal(k3, (N2, C2, H2, W2), dtype=jnp.float32)
    bound2 = 1.0 / (C2 * 9) ** 0.5
    w2 = jax.random.uniform(k4, (C2, C2, 3, 3), jnp.float32, -bound2, bound2)
    gamma2 = 1.0 + 0.1 * jax.random.normal(k5, (C2,), jnp.float32)
    beta2 = 0.1 * jnp.ones((C2,), jnp.float32)

    out2 = downsample_pallas(x2, w2, gamma2, beta2)
    jax.block_until_ready(out2)
    ref2 = downsample_ref(x2, w2, gamma2, beta2)
    assert out2.shape == (N2, C2, H2 // 2, W2 // 2)
    assert jnp.allclose(out2, ref2, atol=1e-4, rtol=1e-4)

    print("KERNEL_OK")
</pallas_src>

<mosaic_0001>
module attributes {stable_mosaic.version = 11 : i64} {
  func.func @stats_only_kernel(%arg0: i32, %arg1: i32, %arg2: memref<1x3x144x4xf32, #tpu.memory_space<vmem>>, %arg3: memref<9x4x128xf32, #tpu.memory_space<vmem>>, %arg4: memref<1x8x128xf32, #tpu.memory_space<vmem>>) attributes {dimension_semantics = [#tpu.dimension_semantics<parallel>, #tpu.dimension_semantics<parallel>], iteration_bounds = array<i64: 2, 1>, scalar_prefetch = 0 : i64, scratch_operands = 0 : i64, tpu.core_type = #tpu.core_type<tc>, window_params = [{transform_indices = @transform_0, window_bounds = array<i64: 1, 3, 144, 4>}, {pipeline_mode = #tpu.pipeline_mode<synchronous>, transform_indices = @transform_1, window_bounds = array<i64: 9, 4, 128>}, {transform_indices = @transform_2, window_bounds = array<i64: 1, 8, 128>}]} {
    %cst = arith.constant 0.000000e+00 : f32
    %0 = vector.broadcast %cst : f32 to vector<64x128xf32>
    %c0 = arith.constant 0 : index
    %c0_0 = arith.constant 0 : index
    %c0_1 = arith.constant 0 : index
    %c0_2 = arith.constant 0 : index
    %1 = vector.load %arg2[%c0, %c0_0, %c0_1, %c0_2] : memref<1x3x144x4xf32, #tpu.memory_space<vmem>>, vector<1x1x64x4xf32>
    %2 = vector.shape_cast %1 : vector<1x1x64x4xf32> to vector<64x4xf32>
    %c0_3 = arith.constant 0 : index
    %c0_4 = arith.constant 0 : index
    %c0_5 = arith.constant 0 : index
    %3 = vector.load %arg3[%c0_3, %c0_4, %c0_5] : memref<9x4x128xf32, #tpu.memory_space<vmem>>, vector<1x4x128xf32>
    %4 = vector.shape_cast %3 : vector<1x4x128xf32> to vector<4x128xf32>
    %cst_6 = arith.constant dense<0.000000e+00> : vector<64x128xf32>
    %5 = tpu.matmul %2, %4, %cst_6 {dimension_numbers = #tpu.dot_dimension_numbers<[1], [0], [0], [1], [0, 0, 1, 1], [], []>} : vector<64x4xf32>, vector<4x128xf32>, vector<64x128xf32> -> vector<64x128xf32>
    %6 = arith.addf %0, %5 : vector<64x128xf32>
    %c0_7 = arith.constant 0 : index
    %c1 = arith.constant 1 : index
    %c0_8 = arith.constant 0 : index
    %c0_9 = arith.constant 0 : index
    %7 = vector.load %arg2[%c0_7, %c1, %c0_8, %c0_9] : memref<1x3x144x4xf32, #tpu.memory_space<vmem>>, vector<1x1x64x4xf32>
    %8 = vector.shape_cast %7 : vector<1x1x64x4xf32> to vector<64x4xf32>
    %c1_10 = arith.constant 1 : index
    %c0_11 = arith.constant 0 : index
    %c0_12 = arith.constant 0 : index
    %9 = vector.load %arg3[%c1_10, %c0_11, %c0_12] : memref<9x4x128xf32, #tpu.memory_space<vmem>>, vector<1x4x128xf32>
    %10 = vector.shape_cast %9 : vector<1x4x128xf32> to vector<4x128xf32>
    %cst_13 = arith.constant dense<0.000000e+00> : vector<64x128xf32>
    %11 = tpu.matmul %8, %10, %cst_13 {dimension_numbers = #tpu.dot_dimension_numbers<[1], [0], [0], [1], [0, 0, 1, 1], [], []>} : vector<64x4xf32>, vector<4x128xf32>, vector<64x128xf32> -> vector<64x128xf32>
    %12 = arith.addf %6, %11 : vector<64x128xf32>
    %c0_14 = arith.constant 0 : index
    %c2 = arith.constant 2 : index
    %c0_15 = arith.constant 0 : index
    %c0_16 = arith.constant 0 : index
    %13 = vector.load %arg2[%c0_14, %c2, %c0_15, %c0_16] : memref<1x3x144x4xf32, #tpu.memory_space<vmem>>, vector<1x1x64x4xf32>
    %14 = vector.shape_cast %13 : vector<1x1x64x4xf32> to vector<64x4xf32>
    %c2_17 = arith.constant 2 : index
    %c0_18 = arith.constant 0 : index
    %c0_19 = arith.constant 0 : index
    %15 = vector.load %arg3[%c2_17, %c0_18, %c0_19] : memref<9x4x128xf32, #tpu.memory_space<vmem>>, vector<1x4x128xf32>
    %16 = vector.shape_cast %15 : vector<1x4x128xf32> to vector<4x128xf32>
    %cst_20 = arith.constant dense<0.000000e+00> : vector<64x128xf32>
    %17 = tpu.matmul %14, %16, %cst_20 {dimension_numbers = #tpu.dot_dimension_numbers<[1], [0], [0], [1], [0, 0, 1, 1], [], []>} : vector<64x4xf32>, vector<4x128xf32>, vector<64x128xf32> -> vector<64x128xf32>
    %18 = arith.addf %12, %17 : vector<64x128xf32>
    %c0_21 = arith.constant 0 : index
    %c0_22 = arith.constant 0 : index
    %c72 = arith.constant 72 : index
    %c0_23 = arith.constant 0 : index
    %19 = vector.load %arg2[%c0_21, %c0_22, %c72, %c0_23] : memref<1x3x144x4xf32, #tpu.memory_space<vmem>>, vector<1x1x64x4xf32>
    %20 = vector.shape_cast %19 : vector<1x1x64x4xf32> to vector<64x4xf32>
    %c3 = arith.constant 3 : index
    %c0_24 = arith.constant 0 : index
    %c0_25 = arith.constant 0 : index
    %21 = vector.load %arg3[%c3, %c0_24, %c0_25] : memref<9x4x128xf32, #tpu.memory_space<vmem>>, vector<1x4x128xf32>
    %22 = vector.shape_cast %21 : vector<1x4x128xf32> to vector<4x128xf32>
    %cst_26 = arith.constant dense<0.000000e+00> : vector<64x128xf32>
    %23 = tpu.matmul %20, %22, %cst_26 {dimension_numbers = #tpu.dot_dimension_numbers<[1], [0], [0], [1], [0, 0, 1, 1], [], []>} : vector<64x4xf32>, vector<4x128xf32>, vector<64x128xf32> -> vector<64x128xf32>
    %24 = arith.addf %18, %23 : vector<64x128xf32>
    %c0_27 = arith.constant 0 : index
    %c1_28 = arith.constant 1 : index
    %c72_29 = arith.constant 72 : index
    %c0_30 = arith.constant 0 : index
    %25 = vector.load %arg2[%c0_27, %c1_28, %c72_29, %c0_30] : memref<1x3x144x4xf32, #tpu.memory_space<vmem>>, vector<1x1x64x4xf32>
    %26 = vector.shape_cast %25 : vector<1x1x64x4xf32> to vector<64x4xf32>
    %c4 = arith.constant 4 : index
    %c0_31 = arith.constant 0 : index
    %c0_32 = arith.constant 0 : index
    %27 = vector.load %arg3[%c4, %c0_31, %c0_32] : memref<9x4x128xf32, #tpu.memory_space<vmem>>, vector<1x4x128xf32>
    %28 = vector.shape_cast %27 : vector<1x4x128xf32> to vector<4x128xf32>
    %cst_33 = arith.constant dense<0.000000e+00> : vector<64x128xf32>
    %29 = tpu.matmul %26, %28, %cst_33 {dimension_numbers = #tpu.dot_dimension_numbers<[1], [0], [0], [1], [0, 0, 1, 1], [], []>} : vector<64x4xf32>, vector<4x128xf32>, vector<64x128xf32> -> vector<64x128xf32>
    %30 = arith.addf %24, %29 : vector<64x128xf32>
    %c0_34 = arith.constant 0 : index
    %c2_35 = arith.constant 2 : index
    %c72_36 = arith.constant 72 : index
    %c0_37 = arith.constant 0 : index
    %31 = vector.load %arg2[%c0_34, %c2_35, %c72_36, %c0_37] : memref<1x3x144x4xf32, #tpu.memory_space<vmem>>, vector<1x1x64x4xf32>
    %32 = vector.shape_cast %31 : vector<1x1x64x4xf32> to vector<64x4xf32>
    %c5 = arith.constant 5 : index
    %c0_38 = arith.constant 0 : index
    %c0_39 = arith.constant 0 : index
    %33 = vector.load %arg3[%c5, %c0_38, %c0_39] : memref<9x4x128xf32, #tpu.memory_space<vmem>>, vector<1x4x128xf32>
    %34 = vector.shape_cast %33 : vector<1x4x128xf32> to vector<4x128xf32>
    %cst_40 = arith.constant dense<0.000000e+00> : vector<64x128xf32>
    %35 = tpu.matmul %32, %34, %cst_40 {dimension_numbers = #tpu.dot_dimension_numbers<[1], [0], [0], [1], [0, 0, 1, 1], [], []>} : vector<64x4xf32>, vector<4x128xf32>, vector<64x128xf32> -> vector<64x128xf32>
    %36 = arith.addf %30, %35 : vector<64x128xf32>
    %c0_41 = arith.constant 0 : index
    %c0_42 = arith.constant 0 : index
    %c8 = arith.constant 8 : index
    %c0_43 = arith.constant 0 : index
    %37 = vector.load %arg2[%c0_41, %c0_42, %c8, %c0_43] : memref<1x3x144x4xf32, #tpu.memory_space<vmem>>, vector<1x1x64x4xf32>
    %38 = vector.shape_cast %37 : vector<1x1x64x4xf32> to vector<64x4xf32>
    %c6 = arith.constant 6 : index
    %c0_44 = arith.constant 0 : index
    %c0_45 = arith.constant 0 : index
    %39 = vector.load %arg3[%c6, %c0_44, %c0_45] : memref<9x4x128xf32, #tpu.memory_space<vmem>>, vector<1x4x128xf32>
    %40 = vector.shape_cast %39 : vector<1x4x128xf32> to vector<4x128xf32>
    %cst_46 = arith.constant dense<0.000000e+00> : vector<64x128xf32>
    %41 = tpu.matmul %38, %40, %cst_46 {dimension_numbers = #tpu.dot_dimension_numbers<[1], [0], [0], [1], [0, 0, 1, 1], [], []>} : vector<64x4xf32>, vector<4x128xf32>, vector<64x128xf32> -> vector<64x128xf32>
    %42 = arith.addf %36, %41 : vector<64x128xf32>
    %c0_47 = arith.constant 0 : index
    %c1_48 = arith.constant 1 : index
    %c8_49 = arith.constant 8 : index
    %c0_50 = arith.constant 0 : index
    %43 = vector.load %arg2[%c0_47, %c1_48, %c8_49, %c0_50] : memref<1x3x144x4xf32, #tpu.memory_space<vmem>>, vector<1x1x64x4xf32>
    %44 = vector.shape_cast %43 : vector<1x1x64x4xf32> to vector<64x4xf32>
    %c7 = arith.constant 7 : index
    %c0_51 = arith.constant 0 : index
    %c0_52 = arith.constant 0 : index
    %45 = vector.load %arg3[%c7, %c0_51, %c0_52] : memref<9x4x128xf32, #tpu.memory_space<vmem>>, vector<1x4x128xf32>
    %46 = vector.shape_cast %45 : vector<1x4x128xf32> to vector<4x128xf32>
    %cst_53 = arith.constant dense<0.000000e+00> : vector<64x128xf32>
    %47 = tpu.matmul %44, %46, %cst_53 {dimension_numbers = #tpu.dot_dimension_numbers<[1], [0], [0], [1], [0, 0, 1, 1], [], []>} : vector<64x4xf32>, vector<4x128xf32>, vector<64x128xf32> -> vector<64x128xf32>
    %48 = arith.addf %42, %47 : vector<64x128xf32>
    %c0_54 = arith.constant 0 : index
    %c2_55 = arith.constant 2 : index
    %c8_56 = arith.constant 8 : index
    %c0_57 = arith.constant 0 : index
    %49 = vector.load %arg2[%c0_54, %c2_55, %c8_56, %c0_57] : memref<1x3x144x4xf32, #tpu.memory_space<vmem>>, vector<1x1x64x4xf32>
    %50 = vector.shape_cast %49 : vector<1x1x64x4xf32> to vector<64x4xf32>
    %c8_58 = arith.constant 8 : index
    %c0_59 = arith.constant 0 : index
    %c0_60 = arith.constant 0 : index
    %51 = vector.load %arg3[%c8_58, %c0_59, %c0_60] : memref<9x4x128xf32, #tpu.memory_space<vmem>>, vector<1x4x128xf32>
    %52 = vector.shape_cast %51 : vector<1x4x128xf32> to vector<4x128xf32>
    %cst_61 = arith.constant dense<0.000000e+00> : vector<64x128xf32>
    %53 = tpu.matmul %50, %52, %cst_61 {dimension_numbers = #tpu.dot_dimension_numbers<[1], [0], [0], [1], [0, 0, 1, 1], [], []>} : vector<64x4xf32>, vector<4x128xf32>, vector<64x128xf32> -> vector<64x128xf32>
    %54 = arith.addf %48, %53 : vector<64x128xf32>
    %55 = tpu.iota {dimensions = array<i32: 0>} : vector<64x1xi32>
    %c8_i32 = arith.constant 8 : i32
    %56 = arith.muli %arg1, %c8_i32 : i32
    %c8_i32_62 = arith.constant 8 : i32
    %57 = arith.subi %c8_i32_62, %56 : i32
    %c8_i32_63 = arith.constant 8 : i32
    %58 = arith.muli %57, %c8_i32_63 : i32
    %59 = vector.broadcast %58 : i32 to vector<64x1xi32>
    %60 = arith.cmpi slt, %55, %59 : vector<64x1xi32>
    %cst_64 = arith.constant 0.000000e+00 : f32
    %61 = vector.shape_cast %60 : vector<64x1xi1> to vector<64x1xi1>
    %62 = vector.broadcast %61 : vector<64x1xi1> to vector<64x128xi1>
    %63 = vector.broadcast %cst_64 : f32 to vector<64x128xf32>
    %64 = arith.select %62, %54, %63 : vector<64x128xi1>, vector<64x128xf32>
    %cst_65 = arith.constant dense<0.000000e+00> : vector<128xf32>
    %65 = vector.multi_reduction <add>, %64, %cst_65 [0] : vector<64x128xf32> to vector<128xf32>
    %66 = vector.shape_cast %65 : vector<128xf32> to vector<1x128xf32>
    %67 = arith.mulf %64, %64 : vector<64x128xf32>
    %cst_66 = arith.constant dense<0.000000e+00> : vector<128xf32>
    %68 = vector.multi_reduction <add>, %67, %cst_66 [0] : vector<64x128xf32> to vector<128xf32>
    %69 = vector.shape_cast %68 : vector<128xf32> to vector<1x128xf32>
    %cst_67 = arith.constant 0.000000e+00 : f32
    %70 = vector.broadcast %cst_67 : f32 to vector<6x128xf32>
    %71 = tpu.concatenate %66, %69, %70 in 0 : vector<1x128xf32>, vector<1x128xf32>, vector<6x128xf32> -> vector<8x128xf32>
    %c0_68 = arith.constant 0 : index
    %c0_69 = arith.constant 0 : index
    %c0_70 = arith.constant 0 : index
    %72 = vector.load %arg4[%c0_68, %c0_69, %c0_70] : memref<1x8x128xf32, #tpu.memory_space<vmem>>, vector<1x8x128xf32>
    %73 = vector.shape_cast %72 : vector<1x8x128xf32> to vector<8x128xf32>
    %74 = vector.shape_cast %71 : vector<8x128xf32> to vector<1x8x128xf32>
    tpu.vector_store %arg4[%c0_68, %c0_69, %c0_70], %74 {strides = array<i32>} : memref<1x8x128xf32, #tpu.memory_space<vmem>>, vector<1x8x128xf32>,
    return
  }
  func.func @transform_0(%arg0: i32, %arg1: i32) -> (i32, i32, i32, i32) {
    %c1_i32 = arith.constant 1 : i32
    %0 = arith.muli %arg0, %c1_i32 : i32
    %1 = arith.addi %0, %arg1 : i32
    %c0_i32 = arith.constant 0 : i32
    %c0_i32_0 = arith.constant 0 : i32
    %c0_i32_1 = arith.constant 0 : i32
    %c0_i32_2 = arith.constant 0 : i32
    return %1, %c0_i32, %c0_i32_0, %c0_i32_1 : i32, i32, i32, i32
  }
  func.func @transform_1(%arg0: i32, %arg1: i32) -> (i32, i32, i32) {
    %c0_i32 = arith.constant 0 : i32
    %c0_i32_0 = arith.constant 0 : i32
    %c0_i32_1 = arith.constant 0 : i32
    %c0_i32_2 = arith.constant 0 : i32
    return %c0_i32, %c0_i32_0, %c0_i32_1 : i32, i32, i32
  }
  func.func @transform_2(%arg0: i32, %arg1: i32) -> (i32, i32, i32) {
    %c1_i32 = arith.constant 1 : i32
    %0 = arith.muli %arg0, %c1_i32 : i32
    %1 = arith.addi %0, %arg1 : i32
    %c0_i32 = arith.constant 0 : i32
    %c0_i32_0 = arith.constant 0 : i32
    %c0_i32_1 = arith.constant 0 : i32
    return %1, %c0_i32, %c0_i32_0 : i32, i32, i32
  }
}

</mosaic_0001>

<bundles_post_ra>
// kernel: tpu_custom_call.1
= control target key start
LH: loop header
LB: loop body
LE: loop exit
PB: predicated region body
PF: predicated region fallthrough
CT: control target
= control target key end

     0   :  { %7 = vsyncpa [#allocation3], 0  ;;  %s1709_s0 = inlined_call_operand.vmem [shape: f32[2,3,144,4], index: 0, kind: input, shape index: {}]   ;;  %s1710_s1 = inlined_call_operand.vmem [shape: f32[9,4,128], index: 1, kind: input, shape index: {}]   ;;  %s1711_s2 = inlined_call_operand.hbm [shape: f32[2,8,128], index: 2, kind: output, shape index: {}]  }
   0x1   :  { %9 = vsyncpa [#allocation3 + $0x1], 0  ;;  %s1396_s9 = smov 0   ;;  %s1398_s10 = smov 0  }
   0x2   :  { %s1400_s11 = smov 0   ;;  %s1402_s12 = smov 0  }
   0x3   :  { %s1404_s13 = smov 0   ;;  %s1406_s14 = smov 0  }
   0x4 LB: > { %s1094_s15 = sadd.s32 4294967295, %s1379_s14   ;;  %s1095_s16 = sadd.s32 4294967294, %s1379_s14   ;;  %s1379_s14 = sphi %s1406_s14, %s15_s14   ;;  %s1375_s13 = sphi %s1404_s13, %s1718_s13   ;;  %s1371_s12 = sphi %s1402_s12, %s1717_s12   ;;  %s1367_s11 = sphi %s1400_s11, %s1716_s11   ;;  %s1363_s10 = sphi %s1398_s10, %s1715_s10   ;;  %s1359_s9 = sphi %s1396_s9, %s1714_s9  }
   0x5   : > { %s27_s17 = sadd.s32 1, %s1375_s13  ;;  %s85_s18 = sadd.s32 1, %s1367_s11 }
   0x6   : > { %p29_p0 = scmp.ge.s32.totalorder %s27_s17, 2  ;;  %p95_p1 = scmp.ne.s32.totalorder %s1367_s11, %s1363_s10 }
   0x7   : > { %p96_p2 = scmp.eq.s32.totalorder %s1094_s15, 1  ;;  %p101_p3 = scmp.ne.s32.totalorder %s1363_s10, %s1359_s9 }
   0x8   : > { %s1720_s17 = smov (%p29_p0, %s27_s17), 0  ;;  %p102_p5 = scmp.eq.s32.totalorder %s1095_s16, 1 }
   0x9   : > { %p1436_p4 = por %p96_p2, %p95_p1  ;;  %s82_s20 = ssub.s32 %s1375_s13, %s1720_s17 }
   0xa   : > { %p1098_p6 = scmp.ge.s32.totalorder %s1379_s14, 1  ;;  %p83_p7 = scmp.eq.s32.totalorder %s82_s20, 0 }
   0xb   : > { %p1443_p8 = por %p102_p5, %p101_p3  ;;  %p133_p9 = scmp.lt.s32.totalorder %s1379_s14, 3 }
   0xc   : > { %s1449_s22 = scalar_select %p83_p7, %s1367_s11, %s85_s18  }
   0xd   : > { %p134_p10 = pnand %p1098_p6, %p133_p9 }
   0xe   : > { %p157_p11 = scmp.lt.s32.totalorder (!%p134_p10), %s1371_s12, 1  ;;  %s153_s28 = sand.u32 (!%p134_p10), 1, %s1363_s10  }
   0xf   : > { %137 = sbr.rel (%p134_p10) target bundleno = 321 (0x141), region = 28  ;;  %s1099_s29 = sshll.u32 (!%p134_p10), %s153_s28, 3 }
  0x10   : > { %s1239_s30 = sshll.u32 (!%p134_p10), %s1371_s12, 3  ;;  %s1321_s23 = scalar_lea.hbm (!%p134_p10), %s1711_s2, 16 }
  0x11   : > { %s1021_s5 = scalar_lea.hbm (!%p134_p10), %s1711_s2, %s1239_s30 }
  0x12   : > { %s1025_s8 = sshll.u32 (!%p134_p10), %s1021_s5, 4  ;;  %s1026_s8 = int_to_ptr.hbm [resolvable:$true] %s1025_s8 }
  0x14   : > { %v1109_v0 = vld [vmem:[%s1710_s1 + $0x4] sm:$0xf]  ;;  %vm209_vm0 = vcmask 1043456   ;;  %v1136_v1 = vld [vmem:[%s1710_s1 + $0x8] sm:$0xf]  ;;  %s158_s3 = scalar_select %p157_p11, %s1371_s12, 1 }
  0x15   : > { %1242 = vmatpush.msk.msra.mxu1 %vm209_vm0, %v1109_v0  ;;  %1243 = vmatpush.msk.msra.mxu2 %vm209_vm0, %v1109_v0  ;;  %v1146_v2 = vld [vmem:[%s1710_s1 + $0xc] sm:$0xf]  ;;  %v172_v3 = vld [vmem:[%s1710_s1] sm:$0xf]  ;;  %v1164_v4 = vld [vmem:[%s1710_s1 + $0x10] sm:$0xf] }
  0x16   : > { %1244 = vmatpush.msk.msra.mxu3 %vm209_vm0, %v1109_v0  ;;  %s1245_s6 = smul.u32 432, %s158_s3  ;;  %1110 = vmatpush.msk.msra.mxu0 %vm209_vm0, %v1109_v0  ;;  %vm184_vm1 = vcmask 31744   ;;  %v1192_v5 = vld [vmem:[%s1710_s1 + $0x18] sm:$0xf]  ;;  %v1210_v6 = vld [vmem:[%s1710_s1 + $0x1c] sm:$0xf] }
  0x17   : > { %1137 = vmatpush.msk.msrb.mxu2 %vm209_vm0, %v1136_v1  ;;  %1119 = vmatpush.msk.msrb.mxu1 %vm209_vm0, %v172_v3  ;;  %v1182_v11 = vld [vmem:[%s1710_s1 + $0x14] sm:$0xf]  ;;  %v1228_v12 = vld [vmem:[%s1710_s1 + $0x20] sm:$0xf]  ;;  %vm1004_vm2 = vcmask 1040384   ;;  %vm1006_vm3 = vcmask 1041408  }
  0x18   : > { %1147 = vmatpush.msk.msrb.mxu3 %vm209_vm0, %v1146_v2  ;;  %1165 = vmatpush.msk.msrb.mxu0 %vm209_vm0, %v1164_v4  ;;  %s1479_s15 = scalar_lea.vmem %s1709_s0, %s1245_s6  ;;  %s155_s6 = scalar_lea.vmem [#allocation2], %s1099_s29 }
  0x19   : > { %v1488_v7 = vld [vmem:[%s1479_s15 + $0xa0] sm:$0xff]  ;;  %v1491_v8 = vld [vmem:[%s1479_s15 + $0xb0] sm:$0xff]  ;;  %v1515_v13 = vld [vmem:[%s1479_s15 + $0xa8] sm:$0xff]  ;;  %s1023_s7 = sshll.u32 %s155_s6, 4  ;;  %s1010_s12 = scalar_lea.sflag [#allocation3], %s153_s28  ;;  %s1024_s7 = int_to_ptr.vmem [resolvable:$true] %s1023_s7 }
  0x1a   : > { %v1494_v9 = vld [vmem:[%s1479_s15 + $0xc0] sm:$0xff]  ;;  %1113 = vmatmul.msk.f32.vlgmr.msra.gmra.mxu1 %vm184_vm1, %v1488_v7  ;;  %1115 = vmatmul.msk.f32.vlgmr.msra.gmra.mxu2 %vm184_vm1, %v1491_v8  ;;  %v1101_v10 = vld [vmem:[%s1479_s15 + $0x90] sm:$0xff]  ;;  %v1518_v14 = vld [vmem:[%s1479_s15 + $0xb8] sm:$0xff] }
  0x1b   : > { %1117 = vmatmul.msk.f32.vlgmr.msra.gmra.mxu3 %vm184_vm1, %v1494_v9  ;;  %1111 = vmatmul.msk.f32.vlgmr.msra.gmra.mxu0 %vm184_vm1, %v1101_v10  ;;  %v1521_v15 = vld [vmem:[%s1479_s15 + $0xc8] sm:$0xff]  ;;  %v1524_v16 = vld [vmem:[%s1479_s15 + $0x98] sm:$0xff]  ;;  %v164_v17 = vld [vmem:[%s1479_s15] sm:$0xff] }
  0x1c   : > { %1193 = vmatpush.msk.msra.mxu2 %vm209_vm0, %v1192_v5  ;;  %1211 = vmatpush.msk.msra.mxu3 %vm209_vm0, %v1210_v6  ;;  %v1128_v18 = vld [vmem:[%s1479_s15 + $0x120] sm:$0xff]  ;;  %v409_v19 = vld [vmem:[%s1479_s15 + $0x48] sm:$0xff]  ;;  %v1156_v20 = vld [vmem:[%s1479_s15 + $0xd8] sm:$0xff] }
  0x1d   : > { %1183 = vmatpush.msk.msra.mxu1 %vm209_vm0, %v1182_v11  ;;  %1229 = vmatpush.msk.msra.mxu0 %vm209_vm0, %v1228_v12  ;;  %v165_v21 = vld [vmem:[%s1479_s15 + $0x8] sm:$0xff]  ;;  %v410_v23 = vld [vmem:[%s1479_s15 + $0x50] sm:$0xff]  ;;  %v1157_v24 = vld [vmem:[%s1479_s15 + $0xe0] sm:$0xff] }
  0x1e   : > { %v1129_v22 = vld [vmem:[%s1479_s15 + $0x128] sm:$0xff]  ;;  %v166_v25 = vld [vmem:[%s1479_s15 + $0x10] sm:$0xff]  ;;  %v411_v27 = vld [vmem:[%s1479_s15 + $0x58] sm:$0xff] }
  0x1f   : > { %v1130_v26 = vld [vmem:[%s1479_s15 + $0x130] sm:$0xff]  ;;  %v1158_v28 = vld [vmem:[%s1479_s15 + $0xe8] sm:$0xff]  ;;  %v167_v29 = vld [vmem:[%s1479_s15 + $0x18] sm:$0xff] }
  0x20   : > { %v1131_v30 = vld [vmem:[%s1479_s15 + $0x138] sm:$0xff]  ;;  %v412_v31 = vld [vmem:[%s1479_s15 + $0x60] sm:$0xff]  ;;  %v1159_v32 = vld [vmem:[%s1479_s15 + $0xf0] sm:$0xff] }
  0x21   : > { %v168_v33 = vld [vmem:[%s1479_s15 + $0x20] sm:$0xff]  ;;  %v413_v35 = vld [vmem:[%s1479_s15 + $0x68] sm:$0xff]  ;;  %v1160_v36 = vld [vmem:[%s1479_s15 + $0xf8] sm:$0xff] }
  0x22   : > { %1114 = vmatmul.msk.f32.gmra.mxu1 %vm184_vm1, %v1515_v13  ;;  %1116 = vmatmul.msk.f32.gmra.mxu2 %vm184_vm1, %v1518_v14  ;;  %v1132_v34 = vld [vmem:[%s1479_s15 + $0x140] sm:$0xff]  ;;  %v169_v37 = vld [vmem:[%s1479_s15 + $0x28] sm:$0xff]  ;;  %v414_v39 = vld [vmem:[%s1479_s15 + $0x70] sm:$0xff] }
  0x23   : > { %1118 = vmatmul.msk.f32.gmra.mxu3 %vm184_vm1, %v1521_v15  ;;  %1112 = vmatmul.msk.f32.gmra.mxu0 %vm184_vm1, %v1524_v16  ;;  %v1133_v38 = vld [vmem:[%s1479_s15 + $0x148] sm:$0xff]  ;;  %v1161_v40 = vld [vmem:[%s1479_s15 + $0x100] sm:$0xff]  ;;  %v170_v41 = vld [vmem:[%s1479_s15 + $0x30] sm:$0xff] }
  0x24   : > { %v1134_v42 = vld [vmem:[%s1479_s15 + $0x150] sm:$0xff]  ;;  %v415_v43 = vld [vmem:[%s1479_s15 + $0x78] sm:$0xff]  ;;  %v1162_v44 = vld [vmem:[%s1479_s15 + $0x108] sm:$0xff] }
  0x25   : > { %v171_v45 = vld [vmem:[%s1479_s15 + $0x38] sm:$0xff]  ;;  %v416_v47 = vld [vmem:[%s1479_s15 + $0x80] sm:$0xff]  ;;  %v1163_v48 = vld [vmem:[%s1479_s15 + $0x110] sm:$0xff] }
  0x26   : > { %v1135_v46 = vld [vmem:[%s1479_s15 + $0x158] sm:$0xff]  ;;  %v1174_v49 = vld [vmem:[%s1479_s15 + $0x168] sm:$0xff]  ;;  %v1175_v50 = vld [vmem:[%s1479_s15 + $0x170] sm:$0xff] }
  0x27   : > { %v1176_v51 = vld [vmem:[%s1479_s15 + $0x178] sm:$0xff]  ;;  %v1177_v52 = vld [vmem:[%s1479_s15 + $0x180] sm:$0xff]  ;;  %v1178_v53 = vld [vmem:[%s1479_s15 + $0x188] sm:$0xff] }
  0x28   : > { %v1179_v54 = vld [vmem:[%s1479_s15 + $0x190] sm:$0xff]  ;;  %v1180_v56 = vld [vmem:[%s1479_s15 + $0x198] sm:$0xff]  ;;  %v1181_v61 = vld [vmem:[%s1479_s15 + $0x1a0] sm:$0xff] }
  0x29   : > { %v674_v62 = vld [vmem:[%s1479_s15 + $0x40] sm:$0xff]  ;;  %v1209_v63 = vld [vmem:[%s1479_s15 + $0xd0] sm:$0xff] }
  0x2a   : > { %1120 = vmatmul.msk.f32.vlgmr.msrb.gmra.mxu1 %vm184_vm1, %v164_v17  ;;  %1138 = vmatmul.msk.f32.vlgmr.msrb.gmra.mxu2 %vm184_vm1, %v1128_v18  ;;  %v1227_v1 = vld [vmem:[%s1479_s15 + $0x160] sm:$0xff]  ;;  %s1315_s15 = sshra.s32 %s1026_s8, 4  ;;  %s1316_s15 = int_to_ptr.hbm [resolvable:$true] %s1315_s15 }
  0x2b   : > { %1148 = vmatmul.msk.f32.vlgmr.msrb.gmra.mxu3 %vm184_vm1, %v409_v19  ;;  %1166 = vmatmul.msk.f32.vlgmr.msrb.gmra.mxu0 %vm184_vm1, %v1156_v20  ;;  %s1317_s16 = scalar_lea.hbm %s1316_s15, 8  ;;  %p1322_p1 = scmp.lt.s32.totalorder %s1316_s15, %s1711_s2 }
  0x2c   : > { %p1318_p12 = scmp.ne.s32.totalorder %s1316_s15, %s1317_s16  ;;  %p1323_p2 = scmp.lt.s32.totalorder %s1321_s23, %s1317_s16 }
  0x2e   : > { %p1319_p13 = pnand %p1318_p12, %p1436_p4  ;;  %p1324_p3 = por %p1323_p2, %p1322_p1 }
  0x30   : > { %p1320_p0 = pneg %p1319_p13 }
  0x32   : > { %1121 = vmatmul.msk.f32.gmra.mxu1 %vm184_vm1, %v165_v21  ;;  %1139 = vmatmul.msk.f32.gmra.mxu2 %vm184_vm1, %v1129_v22  ;;  %p1325_p5 = pnand %p1324_p3, %p1320_p0 }
  0x33   : > { %1149 = vmatmul.msk.f32.gmra.mxu3 %vm184_vm1, %v410_v23  ;;  %1167 = vmatmul.msk.f32.gmra.mxu0 %vm184_vm1, %v1157_v24 }
  0x3a   : > { %1122 = vmatmul.msk.f32.gmra.mxu1 %vm184_vm1, %v166_v25  ;;  %1140 = vmatmul.msk.f32.gmra.mxu2 %vm184_vm1, %v1130_v26 }
  0x3b   : > { %1150 = vmatmul.msk.f32.gmra.mxu3 %vm184_vm1, %v411_v27  ;;  %1168 = vmatmul.msk.f32.gmra.mxu0 %vm184_vm1, %v1158_v28 }
  0x42   : > { %1123 = vmatmul.msk.f32.gmra.mxu1 %vm184_vm1, %v167_v29  ;;  %1141 = vmatmul.msk.f32.gmra.mxu2 %vm184_vm1, %v1131_v30 }
  0x43   : > { %1151 = vmatmul.msk.f32.gmra.mxu3 %vm184_vm1, %v412_v31  ;;  %1169 = vmatmul.msk.f32.gmra.mxu0 %vm184_vm1, %v1159_v32 }
  0x4a   : > { %1124 = vmatmul.msk.f32.gmra.mxu1 %vm184_vm1, %v168_v33  ;;  %1142 = vmatmul.msk.f32.gmra.mxu2 %vm184_vm1, %v1132_v34 }
  0x4b   : > { %1152 = vmatmul.msk.f32.gmra.mxu3 %vm184_vm1, %v413_v35  ;;  %1170 = vmatmul.msk.f32.gmra.mxu0 %vm184_vm1, %v1160_v36 }
  0x52   : > { %1125 = vmatmul.msk.f32.gmra.mxu1 %vm184_vm1, %v169_v37  ;;  %1143 = vmatmul.msk.f32.gmra.mxu2 %vm184_vm1, %v1133_v38 }
  0x53   : > { %1153 = vmatmul.msk.f32.gmra.mxu3 %vm184_vm1, %v414_v39  ;;  %1171 = vmatmul.msk.f32.gmra.mxu0 %vm184_vm1, %v1161_v40 }
  0x5a   : > { %1126 = vmatmul.msk.f32.gmra.mxu1 %vm184_vm1, %v170_v41  ;;  %1144 = vmatmul.msk.f32.gmra.mxu2 %vm184_vm1, %v1134_v42 }
  0x5b   : > { %1154 = vmatmul.msk.f32.gmra.mxu3 %vm184_vm1, %v415_v43  ;;  %1172 = vmatmul.msk.f32.gmra.mxu0 %vm184_vm1, %v1162_v44 }
  0x62   : > { %1127 = vmatmul.msk.f32.gmra.mxu1 %vm184_vm1, %v171_v45  ;;  %1145 = vmatmul.msk.f32.gmra.mxu2 %vm184_vm1, %v1135_v46 }
  0x63   : > { %1155 = vmatmul.msk.f32.gmra.mxu3 %vm184_vm1, %v416_v47  ;;  %1173 = vmatmul.msk.f32.gmra.mxu0 %vm184_vm1, %v1163_v48 }
  0x6a   : > { %1184 = vmatmul.msk.f32.vlgmr.msra.gmra.mxu1 %vm184_vm1, %v1174_v49  ;;  %1194 = vmatmul.msk.f32.vlgmr.msra.gmra.mxu2 %vm184_vm1, %v165_v21 }
  0x6b   : > { %1212 = vmatmul.msk.f32.vlgmr.msra.gmra.mxu3 %vm184_vm1, %v1524_v16  ;;  %1230 = vmatmul.msk.f32.vlgmr.msra.gmra.mxu0 %vm184_vm1, %v1129_v22 }
  0x72   : > { %1185 = vmatmul.msk.f32.gmra.mxu1 %vm184_vm1, %v1175_v50  ;;  %1195 = vmatmul.msk.f32.gmra.mxu2 %vm184_vm1, %v166_v25 }
  0x73   : > { %1213 = vmatmul.msk.f32.gmra.mxu3 %vm184_vm1, %v1488_v7  ;;  %1231 = vmatmul.msk.f32.gmra.mxu0 %vm184_vm1, %v1130_v26 }
  0x7a   : > { %1186 = vmatmul.msk.f32.gmra.mxu1 %vm184_vm1, %v1176_v51  ;;  %1196 = vmatmul.msk.f32.gmra.mxu2 %vm184_vm1, %v167_v29 }
  0x7b   : > { %1214 = vmatmul.msk.f32.gmra.mxu3 %vm184_vm1, %v1515_v13  ;;  %1232 = vmatmul.msk.f32.gmra.mxu0 %vm184_vm1, %v1131_v30 }
  0x82   : > { %1187 = vmatmul.msk.f32.gmra.mxu1 %vm184_vm1, %v1177_v52  ;;  %1197 = vmatmul.msk.f32.gmra.mxu2 %vm184_vm1, %v168_v33 }
  0x83   : > { %1215 = vmatmul.msk.f32.gmra.mxu3 %vm184_vm1, %v1491_v8  ;;  %1233 = vmatmul.msk.f32.gmra.mxu0 %vm184_vm1, %v1132_v34 }
  0x8a   : > { %1188 = vmatmul.msk.f32.gmra.mxu1 %vm184_vm1, %v1178_v53  ;;  %1198 = vmatmul.msk.f32.gmra.mxu2 %vm184_vm1, %v169_v37 }
  0x8b   : > { %1216 = vmatmul.msk.f32.gmra.mxu3 %vm184_vm1, %v1518_v14  ;;  %1234 = vmatmul.msk.f32.gmra.mxu0 %vm184_vm1, %v1133_v38 }
  0x92   : > { %1189 = vmatmul.msk.f32.gmra.mxu1 %vm184_vm1, %v1179_v54  ;;  %1199 = vmatmul.msk.f32.gmra.mxu2 %vm184_vm1, %v170_v41 }
  0x93   : > { %1217 = vmatmul.msk.f32.gmra.mxu3 %vm184_vm1, %v1494_v9  ;;  %1235 = vmatmul.msk.f32.gmra.mxu0 %vm184_vm1, %v1134_v42 }
  0x97   : > { %v236_v55 = vpop.f32.mrf.mxu1 }
  0x98   : > { %v230_v57 = vpop.f32.mrf.mxu0 }
  0x9a   : > { %1190 = vmatmul.msk.f32.gmra.mxu1 %vm184_vm1, %v1180_v56  ;;  %1200 = vmatmul.msk.f32.gmra.mxu2 %vm184_vm1, %v171_v45 }
  0x9b   : > { %1218 = vmatmul.msk.f32.gmra.mxu3 %vm184_vm1, %v1521_v15  ;;  %1236 = vmatmul.msk.f32.gmra.mxu0 %vm184_vm1, %v1135_v46 }
  0x9d   : > { %v242_v58 = vpop.f32.mrf.mxu2 }
  0x9e   : > { %v1640_v59 = vpop.f32.mrf.mxu3 }
  0x9f   : > { %v239_v60 = vpop.f32.mrf.mxu1 }
  0xa0   : > { %v233_v0 = vpop.f32.mrf.mxu0 }
  0xa2   : > { %1191 = vmatmul.msk.f32.gmra.mxu1 %vm184_vm1, %v1181_v61  ;;  %1201 = vmatmul.msk.f32.gmra.mxu2 %vm184_vm1, %v674_v62 }
  0xa3   : > { %1219 = vmatmul.msk.f32.gmra.mxu3 %vm184_vm1, %v1209_v63  ;;  %1237 = vmatmul.msk.f32.gmra.mxu0 %vm184_vm1, %v1227_v1 }
  0xa5   : > { %v245_v2 = vpop.f32.mrf.mxu2 }
  0xa6   : > { %v1650_v3 = vpop.f32.mrf.mxu3 }
  0xa7   : > { %v298_v4 = vpop.f32.mrf.mxu1 }
  0xa8   : > { %v299_v5 = vadd.f32 %v298_v4, %v230_v57  ;;  %v549_v6 = vpop.f32.mrf.mxu0 }
  0xad   : > { %v377_v7 = vpop.f32.mrf.mxu2 }
  0xae   : > { %v401_v8 = vadd.f32 %v377_v7, %v299_v5  ;;  %v463_v9 = vpop.f32.mrf.mxu3 }
  0xaf   : > { %v301_v10 = vpop.f32.mrf.mxu1 }
  0xb0   : > { %v302_v11 = vadd.f32 %v301_v10, %v233_v0  ;;  %v487_v12 = vadd.f32 %v463_v9, %v401_v8  ;;  %v552_v13 = vpop.f32.mrf.mxu0 }
  0xb2   : > { %v573_v14 = vadd.f32 %v549_v6, %v487_v12 }
  0xb5   : > { %v380_v15 = vpop.f32.mrf.mxu2 }
  0xb6   : > { %v402_v16 = vadd.f32 %v380_v15, %v302_v11  ;;  %v466_v17 = vpop.f32.mrf.mxu3 }
  0xb7   : > { %v304_v18 = vpop.f32.mrf.mxu1 }
  0xb8   : > { %v305_v19 = vadd.f32 %v304_v18, %v236_v55  ;;  %v488_v20 = vadd.f32 %v466_v17, %v402_v16  ;;  %v555_v21 = vpop.f32.mrf.mxu0 }
  0xba   : > { %v574_v22 = vadd.f32 %v552_v13, %v488_v20 }
  0xbd   : > { %v383_v23 = vpop.f32.mrf.mxu2 }
  0xbe   : > { %v403_v24 = vadd.f32 %v383_v23, %v305_v19  ;;  %v469_v25 = vpop.f32.mrf.mxu3 }
  0xbf   : > { %v307_v26 = vpop.f32.mrf.mxu1 }
  0xc0   : > { %v308_v27 = vadd.f32 %v307_v26, %v239_v60  ;;  %v489_v28 = vadd.f32 %v469_v25, %v403_v24  ;;  %v558_v29 = vpop.f32.mrf.mxu0 }
  0xc2   : > { %v575_v30 = vadd.f32 %v555_v21, %v489_v28 }
  0xc5   : > { %v386_v31 = vpop.f32.mrf.mxu2 }
  0xc6   : > { %v404_v32 = vadd.f32 %v386_v31, %v308_v27  ;;  %v472_v33 = vpop.f32.mrf.mxu3 }
  0xc7   : > { %v310_v34 = vpop.f32.mrf.mxu1 }
  0xc8   : > { %v311_v35 = vadd.f32 %v310_v34, %v242_v58  ;;  %v490_v36 = vadd.f32 %v472_v33, %v404_v32  ;;  %v561_v37 = vpop.f32.mrf.mxu0 }
  0xca   : > { %v576_v38 = vadd.f32 %v558_v29, %v490_v36 }
  0xcd   : > { %v389_v39 = vpop.f32.mrf.mxu2 }
  0xce   : > { %v405_v40 = vadd.f32 %v389_v39, %v311_v35  ;;  %v475_v41 = vpop.f32.mrf.mxu3 }
  0xcf   : > { %v313_v42 = vpop.f32.mrf.mxu1 }
  0xd0   : > { %v314_v43 = vadd.f32 %v313_v42, %v245_v2  ;;  %v491_v44 = vadd.f32 %v475_v41, %v405_v40  ;;  %v564_v45 = vpop.f32.mrf.mxu0 }
  0xd2   : > { %v577_v46 = vadd.f32 %v561_v37, %v491_v44 }
  0xd5   : > { %v392_v47 = vpop.f32.mrf.mxu2 }
  0xd6   : > { %v406_v48 = vadd.f32 %v392_v47, %v314_v43  ;;  %v478_v49 = vpop.f32.mrf.mxu3 }
  0xd7   : > { %v316_v50 = vpop.f32.mrf.mxu1 }
  0xd8   : > { %v492_v51 = vadd.f32 %v478_v49, %v406_v48  ;;  %v1652_v52 = vpop.f32.mrf.mxu0 }
  0xda   : > { %v578_v53 = vadd.f32 %v564_v45, %v492_v51 }
  0xdd   : > { %v395_v54 = vpop.f32.mrf.mxu2 }
  0xde   : > { %v1654_v55 = vpop.f32.mrf.mxu3 }
  0xdf   : > { %v1656_v56 = vpop.f32.mrf.mxu1 }
  0xe0   : > { %v1658_v57 = vpop.f32.mrf.mxu0 }
  0xe5   : > { %v1660_v58 = vpop.f32.mrf.mxu2 }
  0xe6   : > { %v1662_v60 = vpop.f32.mrf.mxu3 }
  0xe7   : > { %v635_v61 = vpop.f32.mrf.mxu1 }
  0xe8   : > { %v893_v62 = vpop.f32.mrf.mxu0  ;;  %v659_v0 = vadd.f32 %v635_v61, %v573_v14 }
  0xed   : > { %v721_v63 = vpop.f32.mrf.mxu2 }
  0xee   : > { %v807_v1 = vpop.f32.mrf.mxu3  ;;  %v745_v4 = vadd.f32 %v721_v63, %v659_v0 }
  0xef   : > { %v638_v2 = vpop.f32.mrf.mxu1 }
  0xf0   : > { %v896_v5 = vpop.f32.mrf.mxu0  ;;  %v660_v6 = vadd.f32 %v638_v2, %v574_v22  ;;  %v831_v7 = vadd.f32 %v807_v1, %v745_v4 }
  0xf2   : > { %v917_v12 = vadd.f32 %v893_v62, %v831_v7 }
  0xf4   : > { %v983_v17 = vmul.f32 %v917_v12, %v917_v12 }
  0xf5   : > { %v724_v8 = vpop.f32.mrf.mxu2 }
  0xf6   : > { %v746_v9 = vadd.f32 %v724_v8, %v660_v6  ;;  %v810_v10 = vpop.f32.mrf.mxu3  ;;  %v320_v8 = vadd.f32 %v1656_v56, %v1650_v3 }
  0xf7   : > { %v641_v11 = vpop.f32.mrf.mxu1 }
  0xf8   : > { %v832_v13 = vadd.f32 %v810_v10, %v746_v9  ;;  %v899_v15 = vpop.f32.mrf.mxu0  ;;  %v661_v18 = vadd.f32 %v641_v11, %v575_v30 }
  0xfa   : > { %v918_v16 = vadd.f32 %v896_v5, %v832_v13 }
  0xfc   : > { %v970_v19 = vadd.f32 %v918_v16, %v917_v12  ;;  %v984_v20 = vmul.f32 %v918_v16, %v918_v16 }
  0xfd   : > { %v727_v21 = vpop.f32.mrf.mxu2 }
  0xfe   : > { %v991_v14 = vadd.f32 %v984_v20, %v983_v17  ;;  %v747_v23 = vadd.f32 %v727_v21, %v661_v18  ;;  %v813_v24 = vpop.f32.mrf.mxu3 }
  0xff   : > { %v644_v25 = vpop.f32.mrf.mxu1 }
 0x100   : > { %v833_v26 = vadd.f32 %v813_v24, %v747_v23  ;;  %v902_v22 = vpop.f32.mrf.mxu0  ;;  %v662_v28 = vadd.f32 %v644_v25, %v576_v38  ;;  %v317_v38 = vadd.f32 %v316_v50, %v1640_v59  ;;  %v408_v50 = vadd.f32 %v1660_v58, %v320_v8 }
 0x102   : > { %v919_v27 = vadd.f32 %v899_v15, %v833_v26  ;;  %v407_v51 = vadd.f32 %v395_v54, %v317_v38 }
 0x104   : > { %v971_v29 = vadd.f32 %v970_v19, %v919_v27  ;;  %v985_v31 = vmul.f32 %v919_v27, %v919_v27  ;;  %v493_v4 = vadd.f32 %v1654_v55, %v407_v51  ;;  %v494_v55 = vadd.f32 %v1662_v60, %v408_v50 }
 0x105   : > { %v730_v32 = vpop.f32.mrf.mxu2 }
 0x106   : > { %v992_v33 = vadd.f32 %v991_v14, %v985_v31  ;;  %v748_v34 = vadd.f32 %v730_v32, %v662_v28  ;;  %v816_v35 = vpop.f32.mrf.mxu3  ;;  %v579_v59 = vadd.f32 %v1652_v52, %v493_v4  ;;  %v580_v3 = vadd.f32 %v1658_v57, %v494_v55 }
 0x107   : > { %v647_v36 = vpop.f32.mrf.mxu1 }
 0x108   : > { %v834_v37 = vadd.f32 %v816_v35, %v748_v34  ;;  %v905_v30 = vpop.f32.mrf.mxu0  ;;  %v663_v40 = vadd.f32 %v647_v36, %v577_v46 }
 0x10a   : > { %v920_v39 = vadd.f32 %v902_v22, %v834_v37 }
 0x10c   : > { %v972_v41 = vadd.f32 %v971_v29, %v920_v39  ;;  %v986_v42 = vmul.f32 %v920_v39, %v920_v39 }
 0x10d   : > { %v733_v43 = vpop.f32.mrf.mxu2 }
 0x10e   : > { %v993_v44 = vadd.f32 %v992_v33, %v986_v42  ;;  %v749_v45 = vadd.f32 %v733_v43, %v663_v40  ;;  %v819_v47 = vpop.f32.mrf.mxu3 }
 0x10f   : > { %v650_v48 = vpop.f32.mrf.mxu1 }
 0x110   : > { %v835_v49 = vadd.f32 %v819_v47, %v749_v45  ;;  %v908_v62 = vpop.f32.mrf.mxu0  ;;  %v664_v63 = vadd.f32 %v650_v48, %v578_v53 }
 0x112   : > { %v921_v61 = vadd.f32 %v905_v30, %v835_v49 }
 0x114   : > { %v973_v0 = vadd.f32 %v972_v41, %v921_v61  ;;  %v987_v1 = vmul.f32 %v921_v61, %v921_v61 }
 0x115   : > { %v736_v2 = vpop.f32.mrf.mxu2 }
 0x116   : > { %v994_v46 = vadd.f32 %v993_v44, %v987_v1  ;;  %v750_v5 = vadd.f32 %v736_v2, %v664_v63  ;;  %v822_v6 = vpop.f32.mrf.mxu3 }
 0x117   : > { %v653_v7 = vpop.f32.mrf.mxu1 }
 0x118   : > { %v836_v9 = vadd.f32 %v822_v6, %v750_v5  ;;  %v665_v10 = vadd.f32 %v653_v7, %v579_v59  ;;  %v911_v13 = vpop.f32.mrf.mxu0 }
 0x11a   : > { %v922_v54 = vadd.f32 %v908_v62, %v836_v9 }
 0x11c   : > { %v974_v53 = vadd.f32 %v973_v0, %v922_v54  ;;  %v988_v11 = vmul.f32 %v922_v54, %v922_v54 }
 0x11d   : > { %v739_v12 = vpop.f32.mrf.mxu2 }
 0x11e   : > { %v995_v15 = vadd.f32 %v994_v46, %v988_v11  ;;  %v751_v16 = vadd.f32 %v739_v12, %v665_v10  ;;  %v825_v17 = vpop.f32.mrf.mxu3 }
 0x11f   : > { %v656_v19 = vpop.f32.mrf.mxu1 }
 0x120   : > { %v837_v18 = vadd.f32 %v825_v17, %v751_v16  ;;  %v666_v20 = vadd.f32 %v656_v19, %v580_v3  ;;  %v914_v25 = vpop.f32.mrf.mxu0 }
 0x122   : > { %v923_v56 = vadd.f32 %v911_v13, %v837_v18 }
 0x124   : > { %v975_v52 = vadd.f32 %v974_v53, %v923_v56  ;;  %v989_v58 = vmul.f32 %v923_v56, %v923_v56 }
 0x125   : > { %v742_v21 = vpop.f32.mrf.mxu2 }
 0x126   : > { %v996_v14 = vadd.f32 %v995_v15, %v989_v58  ;;  %v752_v23 = vadd.f32 %v742_v21, %v666_v20  ;;  %v828_v24 = vpop.f32.mrf.mxu3 }
 0x128   : > { %v838_v26 = vadd.f32 %v828_v24, %v752_v23 }
 0x12a   : > { %v924_v60 = vadd.f32 %v914_v25, %v838_v26 }
 0x12c   : > { %v976_v22 = vadd.f32 %v975_v52, %v924_v60  ;;  %v990_v27 = vmul.f32 %v924_v60, %v924_v60 }
 0x12e   : > { %v977_v28 = vrot.slane %v976_v22, 4  ;;  %v997_v29 = vadd.f32 %v996_v14, %v990_v27 }
 0x130   : > { %v978_v31 = vadd.f32 %v977_v28, %v976_v22  ;;  %v998_v32 = vrot.slane %v997_v29, 4 }
 0x132   : > { %v979_v57 = vrot.slane %v978_v31, 2  ;;  %v999_v33 = vadd.f32 %v998_v32, %v997_v29 }
 0x134   : > { %v980_v34 = vadd.f32 %v979_v57, %v978_v31  ;;  %v1000_v35 = vrot.slane %v999_v33, 2 }
 0x136   : > { %v981_v36 = vrot.slane %v980_v34, 1  ;;  %v1001_v37 = vadd.f32 %v1000_v35, %v999_v33 }
 0x138   : > { %v1002_v30 = vrot.slane %v1001_v37, 1  ;;  %v982_v39 = vadd.f32 %v981_v36, %v980_v34 }
 0x13a   : > { %v1003_v40 = vadd.f32 %v1002_v30, %v1001_v37 }
 0x13c   : > { %v1005_v41 = vsel %vm1004_vm2, %v982_v39, %v1003_v40 }
 0x13d   : > { %v1007_v42 = vsel %vm1006_vm3, %v1005_v41, 0.0 }
 0x13e   : > { %1008 = vst [vmem:[%s155_s6] sm:$0xff] %v1007_v42 }
 0x13f   : > { %1328 = shalt.err (!%p1325_p5)
}
 0x140   : > { %1246 = dma.vmem_to_hbm [thread:$0]  (%p1436_p4), %s1024_s7, 128, %s1026_s8, %s1010_s12  }
 0x141 PF: > { %p1252_p6 = scmp.ge.s32.totalorder %s1379_s14, 2  ;;  %s1037_s26 = sand.u32 1, %s1359_s9  }
 0x142   : > { %s1038_s27 = scalar_lea.sflag [#allocation3], %s1037_s26 }
 0x143   : > { %p1249_p7 = pnand %p1252_p6, %p1443_p8 }
 0x145   : > { %p1250_p9 = pneg %p1249_p7 }
 0x147   : > { %1354 = dma.done.wait (%p1250_p9), %s1038_s27, 128  }
 0x148   : > { %1356 = vsyncadd (%p1250_p9), %s1038_s27, 4294967168  ;;  %s15_s14 = sadd.s32 1, %s1379_s14   ;;  %s1714_s9 = smov %s1363_s10 }
 0x149   : > { %p12_p10 = scmp.ge.s32.totalorder %s15_s14, 4   ;;  %s1715_s10 = smov %s1367_s11 }
 0x14a   : > { %s1716_s11 = smov %s1449_s22  ;;  %s1717_s12 = smov %s1375_s13 }
 0x14b   : > { %s1718_s13 = smov %s1720_s17  ;;  %14 = sbr.rel (!%p12_p10) target bundleno = 4 (0x4), region = 73 }
 0x150   :  { %1044 = vsyncpa [#allocation3], 1 }
 0x151   :  { %1046 = vsyncpa [#allocation3 + $0x1], 1 }

</bundles_post_ra>
